<compile_context>
chip_gen: v6e
topology: v6e:2x2x1
jax: 0.10.0
libtpu: 0.0.40
codegen_flags: <defaults>
</compile_context>

<pallas_src>
import jax
import jax.numpy as jnp
from jax.experimental import pallas as pl
from jax.experimental.pallas import tpu as pltpu

_MXU_MIN_DIM = 16  # contraction dims below this stay on the VPU as rank-1 updates


def _pick_lane_tile(p, target):
    """Largest tile <= target that divides p and is a multiple of 128.

    Falls back to the full extent p (always a legal block size) when p <=
    target or when no 128-multiple divisor exists.
    """
    if p <= target:
        return p
    t = (target // 128) * 128
    while t >= 128:
        if p % t == 0:
            return t
        t -= 128
    # TODO(synk): no 128-multiple divisor of p <= target; full-extent fallback
    # may use more VMEM than intended for very large, odd P.
    return p


def _pick_row_tile(n, target):
    """Largest tile <= target that divides n and is a multiple of 8 (or n)."""
    if n <= target:
        return n
    t = (target // 8) * 8
    while t >= 8:
        if n % t == 0:
            return t
        t -= 8
    return n


# --------------------------------------------------------------------------
# Kernels
# --------------------------------------------------------------------------
def _mix_kernel_cfirst_mxu(w11_ref, w12_ref, b_ref, x_ref, y_ref, o_ref):
    """out = W11 @ x + W12 @ y + b on one (C, T) tile. MXU path (C >= 16)."""
    o_ref[...] = (
        jnp.dot(w11_ref[...], x_ref[...], preferred_element_type=jnp.float32)
        + jnp.dot(w12_ref[...], y_ref[...], preferred_element_type=jnp.float32)
        + b_ref[...]
    ).astype(o_ref.dtype)


def _mix_kernel_cfirst_vpu(w11_ref, w12_ref, b_ref, x_ref, y_ref, o_ref):
    """out = W11 @ x + W12 @ y + b on one (C, T) tile.

    Tiny-C path: the contraction is C rank-1 (outer-product) updates on the
    VPU, looped over the *true* channel count (no padded zero columns).
    """
    c = x_ref.shape[0]
    x = x_ref[...]
    y = y_ref[...]
    w11 = w11_ref[...]
    w12 = w12_ref[...]
    out = jnp.broadcast_to(b_ref[...], x.shape)  # single broadcast per tile
    for k in range(c):  # static unroll, C is small (< _MXU_MIN_DIM)
        out = out + w11[:, k:k + 1] * x[k:k + 1, :] + w12[:, k:k + 1] * y[k:k + 1, :]
    o_ref[...] = out.astype(o_ref.dtype)


def _mix_kernel_rowmajor_mxu(w11t_ref, w12t_ref, b_ref, x_ref, y_ref, o_ref):
    """out = x @ W11^T + y @ W12^T + b on one (R, F) tile (linear branch)."""
    o_ref[...] = (
        jnp.dot(x_ref[...], w11t_ref[...], preferred_element_type=jnp.float32)
        + jnp.dot(y_ref[...], w12t_ref[...], preferred_element_type=jnp.float32)
        + b_ref[...]
    ).astype(o_ref.dtype)


# --------------------------------------------------------------------------
# Wrappers
# --------------------------------------------------------------------------
def multi_input_conv_forward(x, y, w1, b1, w2, b2, *, pix_tile_target=2048):
    """Conv branch: layer1/layer2 are 1x1 Conv2d(C, C).

    x, y : (N, C, H, W) float32
    w1/w2: (C, C) float32 (torch weight (C, C, 1, 1) squeezed)
    b1/b2: (C,)   float32
    """
    n, c, h, w = x.shape
    p = h * w
    hp = jax.lax.Precision.HIGHEST

    # Pre-compose the two layers (tiny CxC matmuls, once, outside the kernel).
    w11 = jnp.dot(w1, w1, precision=hp)
    w12 = jnp.dot(w1, w2, precision=hp)
    bf = (jnp.dot(w1, b1 + b2, precision=hp) + b1).reshape(c, 1)

    # Free views: NCHW is contiguous, so (N, C, H*W) is just a reshape.
    xr = x.reshape(n, c, p)
    yr = y.reshape(n, c, p)

    tile = _pick_lane_tile(p, pix_tile_target)
    grid = (n, p // tile)

    kernel = _mix_kernel_cfirst_mxu if c >= _MXU_MIN_DIM else _mix_kernel_cfirst_vpu

    const = lambda i, t: (0, 0)        # weights / bias: resident tiny blocks
    data = lambda i, t: (i, 0, t)      # data: (image, full C, pixel tile)

    out = pl.pallas_call(
        kernel,
        out_shape=jax.ShapeDtypeStruct((n, c, p), x.dtype),
        grid=grid,
        in_specs=[
            pl.BlockSpec((c, c), const),
            pl.BlockSpec((c, c), const),
            pl.BlockSpec((c, 1), const),
            pl.BlockSpec((pl.Squeezed(), c, tile), data),
            pl.BlockSpec((pl.Squeezed(), c, tile), data),
        ],
        out_specs=pl.BlockSpec((pl.Squeezed(), c, tile), data),
        compiler_params=pltpu.CompilerParams(
            dimension_semantics=("parallel", "parallel")),
    )(w11, w12, bf, xr, yr)

    return out.reshape(n, c, h, w)


def multi_input_linear_forward(x, y, w1, b1, w2, b2, *, row_tile_target=512):
    """Linear branch: layer1/layer2 are nn.Linear(F, F). x, y: (N, F).

    Native (N, F) layout: batch rows on sublanes, features on lanes — no
    wrapper transpose.  out = x @ (W1 W1)^T + y @ (W1 W2)^T + b_fused.
    """
    nb, f = x.shape
    hp = jax.lax.Precision.HIGHEST

    w11t = jnp.dot(w1, w1, precision=hp).T
    w12t = jnp.dot(w1, w2, precision=hp).T
    bf = (jnp.dot(w1, b1 + b2, precision=hp) + b1).reshape(1, f)

    tile = _pick_row_tile(nb, row_tile_target)
    grid = (nb // tile,)

    const = lambda r: (0, 0)
    data = lambda r: (r, 0)

    # TODO(synk): for F < 16 a rank-1 VPU path (like the conv branch) would
    # avoid an under-utilized MXU matmul; typical Linear widths are >= 16.
    out = pl.pallas_call(
        _mix_kernel_rowmajor_mxu,
        out_shape=jax.ShapeDtypeStruct((nb, f), x.dtype),
        grid=grid,
        in_specs=[
            pl.BlockSpec((f, f), const),
            pl.BlockSpec((f, f), const),
            pl.BlockSpec((1, f), const),
            pl.BlockSpec((tile, f), data),
            pl.BlockSpec((tile, f), data),
        ],
        out_specs=pl.BlockSpec((tile, f), data),
        compiler_params=pltpu.CompilerParams(
            dimension_semantics=("parallel",)),
    )(w11t, w12t, bf, x, y)

    return out


if __name__ == "__main__":
    key = jax.random.PRNGKey(0)
    ks = jax.random.split(key, 12)
    hp = jax.lax.Precision.HIGHEST

    # ------------- conv branch: use_conv=True, input_output=(4, ...) --------
    N, C, H, W = 2, 4, 16, 16
    x = jax.random.normal(ks[0], (N, C, H, W), dtype=jnp.float32)
    y = jax.random.normal(ks[1], (N, C, H, W), dtype=jnp.float32)
    w1 = jax.random.normal(ks[2], (C, C), dtype=jnp.float32) * 0.3
    b1 = jax.random.normal(ks[3], (C,), dtype=jnp.float32) * 0.1
    w2 = jax.random.normal(ks[4], (C, C), dtype=jnp.float32) * 0.3
    b2 = jax.random.normal(ks[5], (C,), dtype=jnp.float32) * 0.1

    out_conv = jax.block_until_ready(
        multi_input_conv_forward(x, y, w1, b1, w2, b2))

    def conv1x1(a, wt, bb):
        return (jnp.einsum("nchw,oc->nohw", a, wt, precision=hp)
                + bb[None, :, None, None])

    ref_conv = conv1x1(conv1x1(x, w1, b1) + conv1x1(y, w2, b2), w1, b1)
    assert out_conv.shape == (N, C, H, W)
    assert jnp.allclose(out_conv, ref_conv, atol=1e-4, rtol=1e-4)

    # ------------- linear branch: use_conv=False, input_output=32 -----------
    NB, F = 4, 32
    xl = jax.random.normal(ks[6], (NB, F), dtype=jnp.float32)
    yl = jax.random.normal(ks[7], (NB, F), dtype=jnp.float32)
    w1l = jax.random.normal(ks[8], (F, F), dtype=jnp.float32) * 0.1
    b1l = jax.random.normal(ks[9], (F,), dtype=jnp.float32) * 0.1
    w2l = jax.random.normal(ks[10], (F, F), dtype=jnp.float32) * 0.1
    b2l = jax.random.normal(ks[11], (F,), dtype=jnp.float32) * 0.1

    out_lin = jax.block_until_ready(
        multi_input_linear_forward(xl, yl, w1l, b1l, w2l, b2l))

    def linear(a, wt, bb):
        return jnp.dot(a, wt.T, precision=hp) + bb

    ref_lin = linear(linear(xl, w1l, b1l) + linear(yl, w2l, b2l), w1l, b1l)
    assert out_lin.shape == (NB, F)
    assert jnp.allclose(out_lin, ref_lin, atol=1e-4, rtol=1e-4)

    print("KERNEL_OK")
</pallas_src>

<mosaic_0001>
module attributes {stable_mosaic.version = 11 : i64} {
  func.func @_mix_kernel_cfirst_vpu(%arg0: i32, %arg1: i32, %arg2: memref<4x4xf32, #tpu.memory_space<vmem>>, %arg3: memref<4x4xf32, #tpu.memory_space<vmem>>, %arg4: memref<4x1xf32, #tpu.memory_space<vmem>>, %arg5: memref<1x4x256xf32, #tpu.memory_space<vmem>>, %arg6: memref<1x4x256xf32, #tpu.memory_space<vmem>>, %arg7: memref<1x4x256xf32, #tpu.memory_space<vmem>>) attributes {dimension_semantics = [#tpu.dimension_semantics<parallel>, #tpu.dimension_semantics<parallel>], iteration_bounds = array<i64: 2, 1>, scalar_prefetch = 0 : i64, scratch_operands = 0 : i64, tpu.core_type = #tpu.core_type<tc>, window_params = [{pipeline_mode = #tpu.pipeline_mode<synchronous>, transform_indices = @transform_0, window_bounds = array<i64: 4, 4>}, {pipeline_mode = #tpu.pipeline_mode<synchronous>, transform_indices = @transform_1, window_bounds = array<i64: 4, 4>}, {pipeline_mode = #tpu.pipeline_mode<synchronous>, transform_indices = @transform_2, window_bounds = array<i64: 4, 1>}, {transform_indices = @transform_3, window_bounds = array<i64: 1, 4, 256>}, {transform_indices = @transform_4, window_bounds = array<i64: 1, 4, 256>}, {transform_indices = @transform_5, window_bounds = array<i64: 1, 4, 256>}]} {
    %c0 = arith.constant 0 : index
    %c0_0 = arith.constant 0 : index
    %c0_1 = arith.constant 0 : index
    %0 = vector.load %arg5[%c0, %c0_0, %c0_1] : memref<1x4x256xf32, #tpu.memory_space<vmem>>, vector<1x4x256xf32>
    %1 = vector.shape_cast %0 : vector<1x4x256xf32> to vector<4x256xf32>
    %c0_2 = arith.constant 0 : index
    %c0_3 = arith.constant 0 : index
    %c0_4 = arith.constant 0 : index
    %2 = vector.load %arg6[%c0_2, %c0_3, %c0_4] : memref<1x4x256xf32, #tpu.memory_space<vmem>>, vector<1x4x256xf32>
    %3 = vector.shape_cast %2 : vector<1x4x256xf32> to vector<4x256xf32>
    %c0_5 = arith.constant 0 : index
    %c0_6 = arith.constant 0 : index
    %4 = vector.load %arg2[%c0_5, %c0_6] : memref<4x4xf32, #tpu.memory_space<vmem>>, vector<4x4xf32>
    %c0_7 = arith.constant 0 : index
    %c0_8 = arith.constant 0 : index
    %5 = vector.load %arg3[%c0_7, %c0_8] : memref<4x4xf32, #tpu.memory_space<vmem>>, vector<4x4xf32>
    %c0_9 = arith.constant 0 : index
    %c0_10 = arith.constant 0 : index
    %6 = vector.load %arg4[%c0_9, %c0_10] : memref<4x1xf32, #tpu.memory_space<vmem>>, vector<4x1xf32>
    %7 = vector.shape_cast %6 : vector<4x1xf32> to vector<4x1xf32>
    %8 = vector.broadcast %7 : vector<4x1xf32> to vector<4x256xf32>
    %9 = vector.extract_strided_slice %4 {offsets = [0, 0], sizes = [4, 1], strides = [1, 1]} : vector<4x4xf32> to vector<4x1xf32>
    %10 = vector.extract_strided_slice %1 {offsets = [0, 0], sizes = [1, 256], strides = [1, 1]} : vector<4x256xf32> to vector<1x256xf32>
    %11 = vector.broadcast %9 : vector<4x1xf32> to vector<4x256xf32>
    %12 = vector.broadcast %10 : vector<1x256xf32> to vector<4x256xf32>
    %13 = arith.mulf %11, %12 : vector<4x256xf32>
    %14 = arith.addf %8, %13 : vector<4x256xf32>
    %15 = vector.extract_strided_slice %5 {offsets = [0, 0], sizes = [4, 1], strides = [1, 1]} : vector<4x4xf32> to vector<4x1xf32>
    %16 = vector.extract_strided_slice %3 {offsets = [0, 0], sizes = [1, 256], strides = [1, 1]} : vector<4x256xf32> to vector<1x256xf32>
    %17 = vector.broadcast %15 : vector<4x1xf32> to vector<4x256xf32>
    %18 = vector.broadcast %16 : vector<1x256xf32> to vector<4x256xf32>
    %19 = arith.mulf %17, %18 : vector<4x256xf32>
    %20 = arith.addf %14, %19 : vector<4x256xf32>
    %21 = vector.extract_strided_slice %4 {offsets = [0, 1], sizes = [4, 1], strides = [1, 1]} : vector<4x4xf32> to vector<4x1xf32>
    %22 = vector.extract_strided_slice %1 {offsets = [1, 0], sizes = [1, 256], strides = [1, 1]} : vector<4x256xf32> to vector<1x256xf32>
    %23 = vector.broadcast %21 : vector<4x1xf32> to vector<4x256xf32>
    %24 = vector.broadcast %22 : vector<1x256xf32> to vector<4x256xf32>
    %25 = arith.mulf %23, %24 : vector<4x256xf32>
    %26 = arith.addf %20, %25 : vector<4x256xf32>
    %27 = vector.extract_strided_slice %5 {offsets = [0, 1], sizes = [4, 1], strides = [1, 1]} : vector<4x4xf32> to vector<4x1xf32>
    %28 = vector.extract_strided_slice %3 {offsets = [1, 0], sizes = [1, 256], strides = [1, 1]} : vector<4x256xf32> to vector<1x256xf32>
    %29 = vector.broadcast %27 : vector<4x1xf32> to vector<4x256xf32>
    %30 = vector.broadcast %28 : vector<1x256xf32> to vector<4x256xf32>
    %31 = arith.mulf %29, %30 : vector<4x256xf32>
    %32 = arith.addf %26, %31 : vector<4x256xf32>
    %33 = vector.extract_strided_slice %4 {offsets = [0, 2], sizes = [4, 1], strides = [1, 1]} : vector<4x4xf32> to vector<4x1xf32>
    %34 = vector.extract_strided_slice %1 {offsets = [2, 0], sizes = [1, 256], strides = [1, 1]} : vector<4x256xf32> to vector<1x256xf32>
    %35 = vector.broadcast %33 : vector<4x1xf32> to vector<4x256xf32>
    %36 = vector.broadcast %34 : vector<1x256xf32> to vector<4x256xf32>
    %37 = arith.mulf %35, %36 : vector<4x256xf32>
    %38 = arith.addf %32, %37 : vector<4x256xf32>
    %39 = vector.extract_strided_slice %5 {offsets = [0, 2], sizes = [4, 1], strides = [1, 1]} : vector<4x4xf32> to vector<4x1xf32>
    %40 = vector.extract_strided_slice %3 {offsets = [2, 0], sizes = [1, 256], strides = [1, 1]} : vector<4x256xf32> to vector<1x256xf32>
    %41 = vector.broadcast %39 : vector<4x1xf32> to vector<4x256xf32>
    %42 = vector.broadcast %40 : vector<1x256xf32> to vector<4x256xf32>
    %43 = arith.mulf %41, %42 : vector<4x256xf32>
    %44 = arith.addf %38, %43 : vector<4x256xf32>
    %45 = vector.extract_strided_slice %4 {offsets = [0, 3], sizes = [4, 1], strides = [1, 1]} : vector<4x4xf32> to vector<4x1xf32>
    %46 = vector.extract_strided_slice %1 {offsets = [3, 0], sizes = [1, 256], strides = [1, 1]} : vector<4x256xf32> to vector<1x256xf32>
    %47 = vector.broadcast %45 : vector<4x1xf32> to vector<4x256xf32>
    %48 = vector.broadcast %46 : vector<1x256xf32> to vector<4x256xf32>
    %49 = arith.mulf %47, %48 : vector<4x256xf32>
    %50 = arith.addf %44, %49 : vector<4x256xf32>
    %51 = vector.extract_strided_slice %5 {offsets = [0, 3], sizes = [4, 1], strides = [1, 1]} : vector<4x4xf32> to vector<4x1xf32>
    %52 = vector.extract_strided_slice %3 {offsets = [3, 0], sizes = [1, 256], strides = [1, 1]} : vector<4x256xf32> to vector<1x256xf32>
    %53 = vector.broadcast %51 : vector<4x1xf32> to vector<4x256xf32>
    %54 = vector.broadcast %52 : vector<1x256xf32> to vector<4x256xf32>
    %55 = arith.mulf %53, %54 : vector<4x256xf32>
    %56 = arith.addf %50, %55 : vector<4x256xf32>
    %c0_11 = arith.constant 0 : index
    %c0_12 = arith.constant 0 : index
    %c0_13 = arith.constant 0 : index
    %57 = vector.load %arg7[%c0_11, %c0_12, %c0_13] : memref<1x4x256xf32, #tpu.memory_space<vmem>>, vector<1x4x256xf32>
    %58 = vector.shape_cast %57 : vector<1x4x256xf32> to vector<4x256xf32>
    %59 = vector.shape_cast %56 : vector<4x256xf32> to vector<1x4x256xf32>
    tpu.vector_store %arg7[%c0_11, %c0_12, %c0_13], %59 {strides = array<i32>} : memref<1x4x256xf32, #tpu.memory_space<vmem>>, vector<1x4x256xf32>,
    return
  }
  func.func @transform_0(%arg0: i32, %arg1: i32) -> (i32, i32) {
    %c0_i32 = arith.constant 0 : i32
    %c0_i32_0 = arith.constant 0 : i32
    %c0_i32_1 = arith.constant 0 : i32
    return %c0_i32, %c0_i32_0 : i32, i32
  }
  func.func @transform_1(%arg0: i32, %arg1: i32) -> (i32, i32) {
    %c0_i32 = arith.constant 0 : i32
    %c0_i32_0 = arith.constant 0 : i32
    %c0_i32_1 = arith.constant 0 : i32
    return %c0_i32, %c0_i32_0 : i32, i32
  }
  func.func @transform_2(%arg0: i32, %arg1: i32) -> (i32, i32) {
    %c0_i32 = arith.constant 0 : i32
    %c0_i32_0 = arith.constant 0 : i32
    %c0_i32_1 = arith.constant 0 : i32
    return %c0_i32, %c0_i32_0 : i32, i32
  }
  func.func @transform_3(%arg0: i32, %arg1: i32) -> (i32, i32, i32) {
    %c0_i32 = arith.constant 0 : i32
    %c0_i32_0 = arith.constant 0 : i32
    return %arg0, %c0_i32, %arg1 : i32, i32, i32
  }
  func.func @transform_4(%arg0: i32, %arg1: i32) -> (i32, i32, i32) {
    %c0_i32 = arith.constant 0 : i32
    %c0_i32_0 = arith.constant 0 : i32
    return %arg0, %c0_i32, %arg1 : i32, i32, i32
  }
  func.func @transform_5(%arg0: i32, %arg1: i32) -> (i32, i32, i32) {
    %c0_i32 = arith.constant 0 : i32
    %c0_i32_0 = arith.constant 0 : i32
    return %arg0, %c0_i32, %arg1 : i32, i32, i32
  }
}

</mosaic_0001>

<bundles_post_ra>
// kernel: tpu_custom_call.1
= control target key start
LH: loop header
LB: loop body
LE: loop exit
PB: predicated region body
PF: predicated region fallthrough
CT: control target
= control target key end

     0   :  { %10 = vsyncpa [#allocation3], 0  ;;  %s1207_s0 = inlined_call_operand.vmem [shape: f32[4,4], index: 0, kind: input, shape index: {}]   ;;  %s1208_s1 = inlined_call_operand.hbm [shape: f32[4,4], index: 1, kind: input, shape index: {}]   ;;  %s1209_s2 = inlined_call_operand.vmem [shape: f32[4,1], index: 2, kind: input, shape index: {}]   ;;  %s1210_s3 = inlined_call_operand.hbm [shape: f32[2,4,256], index: 3, kind: input, shape index: {}]   ;;  %s1211_s4 = inlined_call_operand.hbm [shape: f32[2,4,256], index: 4, kind: input, shape index: {}]   ;;  %s1212_s5 = inlined_call_operand.hbm [shape: f32[2,4,256], index: 5, kind: output, shape index: {}]  }
   0x1   :  { %11 = vsyncpa [#allocation6], 0 }
   0x2   :  { %13 = vsyncpa [#allocation6 + $0x1], 0 }
   0x3   :  { %14 = vsyncpa [#allocation4], 0 }
   0x4   :  { %16 = vsyncpa [#allocation4 + $0x1], 0  ;;  %s996_s18 = smov 0   ;;  %s998_s19 = smov 0  }
   0x5   :  { %s1000_s20 = smov 0   ;;  %s1002_s21 = smov 0  }
   0x6   :  { %s1004_s22 = smov 0   ;;  %s1006_s23 = smov 0  }
   0x7 LB: > { %s34_s24 = sadd.s32 1, %s952_s22  ;;  %s106_s25 = sadd.s32 1, %s944_s20  ;;  %s956_s23 = sphi %s1006_s23, %s22_s23   ;;  %s952_s22 = sphi %s1004_s22, %s1233_s22   ;;  %s948_s21 = sphi %s1002_s21, %s1232_s21   ;;  %s944_s20 = sphi %s1000_s20, %s1231_s20   ;;  %s940_s19 = sphi %s998_s19, %s1230_s19   ;;  %s936_s18 = sphi %s996_s18, %s1229_s18  }
   0x8   : > { %p36_p0 = scmp.ge.s32.totalorder %s34_s24, 2  ;;  %p113_p1 = scmp.ne.s32.totalorder %s944_s20, %s940_s19 }
   0x9   : > { %p114_p2 = scmp.eq.s32.totalorder %s956_s23, 0  ;;  %p727_p5 = scmp.lt.s32.totalorder %s956_s23, 2 }
   0xa   : > { %s1235_s24 = smov (%p36_p0, %s34_s24), 0  ;;  %s216_s27 = sand.u32 1, %s956_s23  }
   0xb   : > { %p115_p4 = por %p114_p2, %p113_p1  ;;  %s101_s26 = ssub.s32 %s952_s22, %s1235_s24 }
   0xc   : > { %p104_p6 = scmp.eq.s32.totalorder %s101_s26, 0  ;;  %s218_s28 = sand.u32 1, %s944_s20  }
   0xd   : > { %s698_s29 = sshll.u32 %s952_s22, 7  ;;  %s1046_s6 = sshll.u32 %s218_s28, 3 }
   0xe   : > { %s1044_s30 = scalar_select %p104_p6, %s944_s20, %s106_s25  }
   0xf   : > { %s228_s9 = scalar_lea.hbm %s1210_s3, %s698_s29  ;;  %p1053_p7 = pnand %p727_p5, %p115_p4 }
  0x10   : > { %s220_s11 = scalar_lea.vmem [#allocation5], %s1046_s6  ;;  %s1058_s13 = scalar_lea.sflag [#allocation6], %s216_s27 }
  0x11   : > { %s230_s12 = sshll.u32 %s220_s11, 4  ;;  %p792_p8 = pneg %p1053_p7  ;;  %s231_s12 = int_to_ptr.vmem [resolvable:$true] %s230_s12 }
  0x12   : > { %s803_s14 = scalar_lea.vmem %s231_s12, 128  ;;  %s958_s15 = smov [#allocation5]  }
  0x13   : > { %p804_p9 = scmp.ne.s32.totalorder %s231_s12, %s803_s14  ;;  %s808_s16 = sshll.u32 %s958_s15, 4  ;;  %s809_s16 = int_to_ptr.vmem [resolvable:$false] %s808_s16 }
  0x14   : > { %s810_s17 = scalar_lea.vmem %s809_s16, 256  ;;  %p811_p12 = scmp.lt.s32.totalorder %s231_s12, %s809_s16 }
  0x15   : > { %p806_p10 = pnand %p804_p9, %p792_p8  ;;  %p812_p13 = scmp.lt.s32.totalorder %s810_s17, %s803_s14 }
  0x17   : > { %p807_p11 = pneg %p806_p10  ;;  %p813_p0 = por %p812_p13, %p811_p12 }
  0x19   : > { %p814_p2 = pnand %p813_p0, %p807_p11 }
  0x1b   : > { %817 = shalt.err (!%p814_p2)
}
  0x1c   : > { %718 = dma.hbm_to_vmem [thread:$0]  (!%p1053_p7), %s228_s9, 128, %s231_s12, %s1058_s13  }
  0x1d   : > { %s1069_s25 = sadd.s32 4294967295, %s956_s23   ;;  %s678_s26 = sadd.s32 4294967294, %s956_s23  }
  0x1e   : > { %p119_p4 = scmp.ne.s32.totalorder %s940_s19, %s936_s18  ;;  %p1213_p5 = scmp.eq.s32.totalorder %s1069_s25, 0 }
  0x1f   : > { %p173_p6 = scmp.eq.s32.totalorder %s1069_s25, 1  ;;  %p179_p9 = scmp.eq.s32.totalorder %s678_s26, 1 }
  0x20   : > { %p679_p10 = scmp.ge.s32.totalorder %s956_s23, 1  ;;  %p1079_p11 = por %p1213_p5, %p119_p4 }
  0x21   : > { %p1086_p12 = por %p173_p6, %p113_p1  ;;  %p1090_p13 = por %p179_p9, %p119_p4 }
  0x22   : > { %s1217_s27 = scalar_select %p1079_p11, 1, 0 }
  0x23   : > { %s1218_s28 = scalar_select %p1086_p12, 1, 0 }
  0x24   : > { %s1219_s7 = scalar_select %p1090_p13, 1, 0 }
  0x25   : > { %p186_p0 = scmp.lt.s32.totalorder %s956_s23, 3  ;;  %s249_s11 = scalar_lea.hbm %s1211_s4, %s698_s29 }
  0x26   : > { %s959_s14 = smov [#allocation2]   ;;  %s241_s16 = scalar_lea.vmem [#allocation7], %s1046_s6 }
  0x27   : > { %p1100_p2 = pnand %p679_p10, %p186_p0  ;;  %s202_s15 = sshll.u32 %s959_s14, 4  ;;  %s203_s15 = int_to_ptr.vmem [resolvable:$true] %s202_s15 }
  0x28   : > { %s251_s17 = sshll.u32 %s241_s16, 4  ;;  %s960_s8 = smov [#allocation7]   ;;  %s252_s17 = int_to_ptr.vmem [resolvable:$true] %s251_s17 }
  0x29   : > { %s831_s26 = scalar_lea.vmem %s252_s17, 128  ;;  %s836_s29 = sshll.u32 %s960_s8, 4  ;;  %s837_s29 = int_to_ptr.vmem [resolvable:$false] %s836_s29 }
  0x2a   : > { %p832_p4 = scmp.ne.s32.totalorder %s252_s17, %s831_s26  ;;  %s838_s9 = scalar_lea.vmem %s837_s29, 256 }
  0x2b   : > { %p839_p10 = scmp.lt.s32.totalorder %s252_s17, %s837_s29  ;;  %p840_p0 = scmp.lt.s32.totalorder %s838_s9, %s831_s26 }
  0x2c   : > { %p834_p6 = pnand %p832_p4, %p792_p8 }
  0x2d   : > { %p841_p3 = por %p840_p0, %p839_p10 }
  0x2e   : > { %p835_p9 = pneg %p834_p6 }
  0x30   : > { %p842_p5 = pnand %p841_p3, %p835_p9 }
  0x32   : > { %845 = shalt.err (!%p842_p5)
}
  0x33   : > { %721 = dma.hbm_to_vmem [thread:$0]  (!%p1053_p7), %s249_s11, 128, %s252_s17, %s1058_s13  }
  0x34   : > { %p1221_p1 = scmp.eq.s32.totalorder %s1069_s25, 0  ;;  %p1222_p8 = pneg %p1100_p2 }
  0x35   : > { %s857_s6 = scalar_lea.vmem %s203_s15, 64  ;;  %p865_p0 = scmp.lt.s32.totalorder %s203_s15, %s203_s15 }
  0x36   : > { %p712_p4 = pnand %p1222_p8, %p1221_p1  ;;  %p858_p13 = scmp.ne.s32.totalorder %s203_s15, %s857_s6 }
  0x37   : > { %p866_p10 = scmp.lt.s32.totalorder %s857_s6, %s857_s6 }
  0x38   : > { %p848_p6 = pneg %p712_p4 }
  0x39   : > { %p867_p3 = por %p866_p10, %p865_p0 }
  0x3a   : > { %p860_p12 = pnand %p858_p13, %p848_p6 }
  0x3c   : > { %p861_p11 = pneg %p860_p12 }
  0x3e   : > { %p868_p5 = pnand %p867_p3, %p861_p11 }
  0x40   : > { %871 = shalt.err (!%p868_p5)
}
  0x41   : > { %714 = dma.hbm_to_vmem [thread:$0]  (!%p712_p4), %s1208_s1, 64, %s203_s15, [#allocation3]  }
  0x42   : > { %260 = sbr.rel (%p1100_p2) target bundleno = 241 (0xf1), region = 40  ;;  %p1223_p7 = scmp.eq.s32.totalorder (!%p1100_p2), %s1069_s25, 0 }
  0x47   : > { %923 = dma.done.wait (%p1223_p7), [#allocation3], 64   ;;  %p1224_p1 = pmov %p1223_p7 }
  0x48   : > { %s266_s13 = sand.u32 1, %s1069_s25   ;;  %s268_s11 = sand.u32 1, %s940_s19  }
  0x49   : > { %925 = vsyncadd (%p1224_p1), [#allocation3], 4294967232  ;;  %s1131_s16 = sshll.u32 %s268_s11, 3  ;;  %s267_s15 = scalar_lea.sflag [#allocation6], %s266_s13 }
  0x4a   : > { %s270_s17 = scalar_lea.vmem [#allocation5], %s1131_s16  ;;  %p1225_p11 = scmp.ne.s32.totalorder %s1217_s27, 0 }
  0x4c   : > { %927 = dma.done.wait (%p1225_p11), %s267_s15, 256  }
  0x4d   : > { %929 = vsyncadd (%p1225_p11), %s267_s15, 4294967040  ;;  %v961_v0 = vmov 0   ;;  %v317_v1 = vld [vmem:[#allocation2] sm:$0xf]  ;;  %v962_v4 = vmov 1   ;;  %v963_v5 = vmov 2   ;;  %v330_v7 = vlaneseq }
  0x4e   : > { %784 = vset.pattern.permute.xlu1 %v961_v0  ;;  %783 = vset.pattern.permute.xlu0 %v961_v0  ;;  %v316_v2 = vld [vmem:[%s1207_s0] sm:$0xf]  ;;  %v964_v6 = vmov 3   ;;  %v314_v9 = vld [vmem:[%s270_s17] sm:$0xff]  ;;  %s279_s27 = scalar_lea.vmem [#allocation7], %s1131_s16  ;;  %s700_s29 = sshll.u32 %s948_s21, 7 }
  0x4f   : > { %354 = vperm.xlu1 %784, %v317_v1   ;;  %326 = vperm.xlu0 %783, %v316_v2   ;;  %v318_v3 = vld [vmem:[%s1209_s2] sm:$0xf]  ;;  %v1144_v8 = vshrl.u32 %v330_v7, 7  ;;  %s310_s9 = scalar_lea.vmem [#allocation8], %s1131_s16  ;;  %s556_s13 = scalar_lea.hbm %s1212_s5, %s700_s29 }
  0x50   : > { %v1149_v14 = vld [vmem:[%s279_s27] sm:$0xff]  ;;  %s558_s6 = sshll.u32 %s310_s9, 4  ;;  %s542_s15 = scalar_lea.sflag [#allocation4], %s268_s11  ;;  %s559_s6 = int_to_ptr.vmem [resolvable:$true] %s558_s6 }
  0x51   : > { %v332_v10 = vsub.s32 0, %v1144_v8  ;;  %v336_v11 = vsub.s32 4, %v1144_v8  ;;  %v386_v15 = vsub.s32 1, %v1144_v8  ;;  %v390_v16 = vsub.s32 5, %v1144_v8  ;;  %s872_s17 = scalar_lea.vmem %s559_s6, 128  ;;  %p1226_p13 = scmp.ne.s32.totalorder %s1218_s28, 0 }
  0x52   : > { %v438_v23 = vsub.s32 2, %v1144_v8  ;;  %v442_v24 = vsub.s32 6, %v1144_v8  ;;  %v490_v37 = vsub.s32 3, %v1144_v8  ;;  %v494_v38 = vsub.s32 7, %v1144_v8  ;;  %p873_p12 = scmp.ne.s32.totalorder %s559_s6, %s872_s17  ;;  %s965_s12 = smov [#allocation8]  }
  0x53   : > { %785 = vset.pattern.permute.xlu1 %v962_v4  ;;  %321 = vperm.xlu0 %783, %v318_v3   ;;  %v333_v12 = vrot.slane %v314_v9, %v332_v10  ;;  %v337_v13 = vrot.slane %v314_v9, %v336_v11  ;;  %v361_v17 = vrot.slane %v1149_v14, %v332_v10  ;;  %s876_s21 = sshll.u32 %s965_s12, 4  ;;  %s877_s21 = int_to_ptr.vmem [resolvable:$false] %s876_s21 }
  0x54   : > { %381 = vperm.xlu1 %785, %v316_v2   ;;  %v365_v18 = vrot.slane %v1149_v14, %v336_v11  ;;  %v387_v21 = vrot.slane %v314_v9, %v386_v15  ;;  %v391_v22 = vrot.slane %v314_v9, %v390_v16  ;;  %v413_v27 = vrot.slane %v1149_v14, %v386_v15  ;;  %p874_p2 = pnand %p873_p12, %p1226_p13  ;;  %s878_s16 = scalar_lea.vmem %s877_s21, 256 }
  0x55   : > { %v343_v19 = vrot.slane %v333_v12, %v332_v10  ;;  %v347_v20 = vrot.slane %v337_v13, %v332_v10  ;;  %v417_v28 = vrot.slane %v1149_v14, %v390_v16  ;;  %v371_v29 = vrot.slane %v361_v17, %v332_v10  ;;  %p879_p8 = scmp.lt.s32.totalorder %s559_s6, %s877_s21  ;;  %p880_p4 = scmp.lt.s32.totalorder %s878_s16, %s872_s17 }
  0x56   : > { %v375_v30 = vrot.slane %v365_v18, %v332_v10  ;;  %v397_v33 = vrot.slane %v387_v21, %v386_v15  ;;  %v401_v34 = vrot.slane %v391_v22, %v386_v15  ;;  %v439_v35 = vrot.slane %v314_v9, %v438_v23  ;;  %p875_p9 = pneg %p874_p2 }
  0x57   : > { %786 = vset.pattern.permute.xlu0 %v962_v4  ;;  %v443_v36 = vrot.slane %v314_v9, %v442_v24  ;;  %v423_v40 = vrot.slane %v413_v27, %v386_v15  ;;  %v427_v41 = vrot.slane %v417_v28, %v386_v15  ;;  %v465_v42 = vrot.slane %v1149_v14, %v438_v23  ;;  %p881_p6 = por %p880_p4, %p879_p8 }
  0x58   : > { %787 = vset.pattern.permute.xlu1 %v963_v5  ;;  %407 = vperm.xlu0 %786, %v317_v1   ;;  %v469_v43 = vrot.slane %v1149_v14, %v442_v24  ;;  %v449_v51 = vrot.slane %v439_v35, %v438_v23  ;;  %v491_v55 = vrot.slane %v314_v9, %v490_v37 }
  0x59   : > { %433 = vperm.xlu1 %787, %v316_v2   ;;  %v453_v52 = vrot.slane %v443_v36, %v438_v23  ;;  %v495_v56 = vrot.slane %v314_v9, %v494_v38  ;;  %v475_v63 = vrot.slane %v465_v42, %v438_v23  ;;  %v517_v7 = vrot.slane %v1149_v14, %v490_v37  ;;  %p882_p0 = pnand %p881_p6, %p875_p9 }
  0x5a   : > { %v479_v0 = vrot.slane %v469_v43, %v438_v23  ;;  %v501_v3 = vrot.slane %v491_v55, %v490_v37  ;;  %v521_v8 = vrot.slane %v1149_v14, %v494_v38 }
  0x5b   : > { %v505_v4 = vrot.slane %v495_v56, %v490_v37  ;;  %v527_v18 = vrot.slane %v517_v7, %v490_v37 }
  0x5c   : > { %788 = vset.pattern.permute.xlu0 %v964_v6 }
  0x5d   : > { %459 = vperm.xlu1 %787, %v317_v1   ;;  %485 = vperm.xlu0 %788, %v316_v2  }
  0x61   : > { %789 = vset.pattern.permute.xlu1 %v964_v6 }
  0x62   : > { %511 = vperm.xlu1 %789, %v317_v1  }
  0xca   : > { %v355_v25 = vpop.permute.xlu1 %354  ;;  %v327_v26 = vpop.permute.xlu0 %326 }
  0xcb   : > { %v348_v31 = vmul.f32 %v343_v19, %v327_v26  ;;  %v349_v32 = vmul.f32 %v347_v20, %v327_v26  ;;  %v376_v44 = vmul.f32 %v371_v29, %v355_v25  ;;  %v377_v45 = vmul.f32 %v375_v30, %v355_v25 }
  0xcc   : > { %v531_v19 = vrot.slane %v521_v8, %v490_v37 }
  0xce   : > { %v322_v39 = vpop.permute.xlu0 %321 }
  0xcf   : > { %v350_v46 = vadd.f32 %v348_v31, %v322_v39  ;;  %v351_v47 = vadd.f32 %v349_v32, %v322_v39  ;;  %v382_v48 = vpop.permute.xlu1 %381 }
  0xd0   : > { %v402_v49 = vmul.f32 %v397_v33, %v382_v48  ;;  %v403_v50 = vmul.f32 %v401_v34, %v382_v48 }
  0xd1   : > { %v378_v53 = vadd.f32 %v376_v44, %v350_v46  ;;  %v379_v54 = vadd.f32 %v377_v45, %v351_v47 }
  0xd3   : > { %v404_v57 = vadd.f32 %v402_v49, %v378_v53  ;;  %v405_v58 = vadd.f32 %v403_v50, %v379_v54  ;;  %v408_v59 = vpop.permute.xlu0 %407 }
  0xd4   : > { %v428_v60 = vmul.f32 %v423_v40, %v408_v59  ;;  %v429_v61 = vmul.f32 %v427_v41, %v408_v59  ;;  %v434_v62 = vpop.permute.xlu1 %433 }
  0xd5   : > { %v454_v1 = vmul.f32 %v449_v51, %v434_v62  ;;  %v455_v2 = vmul.f32 %v453_v52, %v434_v62 }
  0xd6   : > { %v430_v5 = vadd.f32 %v428_v60, %v404_v57  ;;  %v431_v6 = vadd.f32 %v429_v61, %v405_v58 }
  0xd8   : > { %v456_v10 = vadd.f32 %v454_v1, %v430_v5  ;;  %v457_v9 = vadd.f32 %v455_v2, %v431_v6  ;;  %v460_v11 = vpop.permute.xlu1 %459  ;;  %v486_v12 = vpop.permute.xlu0 %485 }
  0xd9   : > { %v480_v13 = vmul.f32 %v475_v63, %v460_v11  ;;  %v481_v15 = vmul.f32 %v479_v0, %v460_v11  ;;  %v506_v16 = vmul.f32 %v501_v3, %v486_v12  ;;  %v507_v17 = vmul.f32 %v505_v4, %v486_v12 }
  0xdb   : > { %v482_v20 = vadd.f32 %v480_v13, %v456_v10  ;;  %v483_v21 = vadd.f32 %v481_v15, %v457_v9 }
  0xdd   : > { %v508_v22 = vadd.f32 %v506_v16, %v482_v20  ;;  %v509_v23 = vadd.f32 %v507_v17, %v483_v21  ;;  %v512_v24 = vpop.permute.xlu1 %511 }
  0xde   : > { %v532_v14 = vmul.f32 %v527_v18, %v512_v24  ;;  %v533_v25 = vmul.f32 %v531_v19, %v512_v24 }
  0xe0   : > { %v534_v26 = vadd.f32 %v532_v14, %v508_v22  ;;  %v535_v27 = vadd.f32 %v533_v25, %v509_v23 }
  0xe2   : > { %v538_v28 = vcombine.low %v534_v26, %v535_v27 }
  0xe4   : > { %540 = vst [vmem:[%s310_s9] sm:$0xff] %v538_v28 }
  0xe5   : > { %885 = shalt.err (!%p882_p0)
}
  0xe6   : > { %s886_s26 = scalar_lea.hbm %s556_s13, 128  ;;  %s890_s8 = scalar_lea.hbm %s1212_s5, 256 }
  0xe7   : > { %p887_p10 = scmp.ne.s32.totalorder %s556_s13, %s886_s26  ;;  %p891_p7 = scmp.lt.s32.totalorder %s556_s13, %s1212_s5 }
  0xe8   : > { %p892_p1 = scmp.lt.s32.totalorder %s890_s8, %s886_s26 }
  0xe9   : > { %p888_p3 = pnand %p887_p10, %p1226_p13 }
  0xea   : > { %p893_p11 = por %p892_p1, %p891_p7 }
  0xeb   : > { %p889_p5 = pneg %p888_p3 }
  0xed   : > { %p894_p12 = pnand %p893_p11, %p889_p5 }
  0xef   : > { %897 = shalt.err (!%p894_p12)
}
  0xf0   : > { %709 = dma.vmem_to_hbm [thread:$0]  (%p1226_p13), %s559_s6, 128, %s556_s13, %s542_s15  }
  0xf1 PF: > { %s570_s9 = sand.u32 1, %s936_s18   ;;  %p1227_p2 = scmp.ne.s32.totalorder %s1219_s7, 0 }
  0xf2   : > { %p1228_p9 = scmp.ge.s32.totalorder %s956_s23, 2  ;;  %s571_s10 = scalar_lea.sflag [#allocation4], %s570_s9 }
  0xf4   : > { %p723_p8 = pnand %p1228_p9, %p1227_p2 }
  0xf6   : > { %p724_p4 = pneg %p723_p8 }
  0xf8   : > { %931 = dma.done.wait (%p724_p4), %s571_s10, 128  }
  0xf9   : > { %933 = vsyncadd (%p724_p4), %s571_s10, 4294967168  ;;  %s22_s23 = sadd.s32 1, %s956_s23   ;;  %s1229_s18 = smov %s940_s19 }
  0xfa   : > { %p19_p6 = scmp.ge.s32.totalorder %s22_s23, 4   ;;  %s1230_s19 = smov %s944_s20 }
  0xfb   : > { %s1231_s20 = smov %s1044_s30  ;;  %s1232_s21 = smov %s952_s22 }
  0xfc   : > { %s1233_s22 = smov %s1235_s24  ;;  %21 = sbr.rel (!%p19_p6) target bundleno = 7 (0x7), region = 101 }
 0x101   :  { %576 = vsyncpa [#allocation3], 1 }
 0x102   :  { %578 = vsyncpa [#allocation3 + $0x1], 1 }
 0x103   :  { %579 = vsyncpa [#allocation6], 1 }
 0x104   :  { %581 = vsyncpa [#allocation6 + $0x1], 1 }
 0x105   :  { %582 = vsyncpa [#allocation4], 1 }
 0x106   :  { %584 = vsyncpa [#allocation4 + $0x1], 1 }

</bundles_post_ra>
